<compile_context>
chip_gen: v5e
topology: v5e:2x2
jax: 0.10.0
libtpu: 0.0.40
codegen_flags: <defaults>
</compile_context>

<pallas_src>
import jax
import jax.numpy as jnp
from jax.experimental import pallas as pl
from jax.experimental.pallas import tpu as pltpu


# ----------------------------- Pallas kernel --------------------------------

def _fuse_conv1x1_kernel(x_ref, w_ref, b_ref, o_ref):
    # x_ref: (BB, K, T) native dtype   w_ref: (N, K) f32 (resident)
    # b_ref: (N, 1) f32 (resident)     o_ref: (BB, N, T) f32
    w = w_ref[...]
    bias = b_ref[...]
    # BB is a small static batch block -> unrolled per-image matmuls, no
    # in-kernel transpose.  Cast to f32 mirrors torch's x.to(torch.float) and
    # keeps HBM reads at the (possibly narrower) native activation dtype.
    # (Add precision=jax.lax.Precision.HIGHEST here if bit-closeness to the
    #  f32 torch conv is required; compute is not the bottleneck.)
    for bi in range(x_ref.shape[0]):
        x = x_ref[bi].astype(jnp.float32)
        acc = jnp.dot(w, x, preferred_element_type=jnp.float32)
        o_ref[bi] = (acc + bias).astype(o_ref.dtype)


_MAX_TILE_HW = 32768          # lane-tile upper bound (multiple of 128)
_VMEM_STEP_BYTES = 6 << 20    # per-grid-step (input + output) VMEM budget
_VMEM_LIMIT_BYTES = 32 << 20  # raise v5e's 16 MiB scoped default; safe everywhere


def _round_up(x, m):
    return -(-x // m) * m


def _choose_tiling(B, K, N, HW, x_itemsize):
    """Pick (batch_block, tile_hw, num_hw_tiles) for the (B, K, HW) input."""
    col_bytes_b1 = K * x_itemsize + N * 4        # bytes per HW column, per image
    # Fold the whole batch into one block when even a minimal 128-lane tile
    # fits the per-step budget: slashes grid steps for small FPN levels.
    bb = B if B * col_bytes_b1 * min(HW, 128) <= _VMEM_STEP_BYTES else 1
    cap = (_VMEM_STEP_BYTES // (bb * col_bytes_b1)) // 128 * 128
    cap = max(128, min(cap, _MAX_TILE_HW))
    if HW <= cap:
        return bb, HW, 1
    # Balanced lane-dense tiles: last block is never mostly padding.
    num_tiles = pl.cdiv(HW, cap)
    tile_hw = _round_up(pl.cdiv(HW, num_tiles), 128)
    num_tiles = pl.cdiv(HW, tile_hw)
    return bb, tile_hw, num_tiles


@jax.jit
def _conv1x1_nchw(x3d, w, b):
    """x3d: (B, K, HW) any float dtype, w: (N, K) f32, b: (N,) f32 -> (B, N, HW) f32."""
    B, K, HW = x3d.shape
    N = w.shape[0]
    bb, tile_hw, num_hw_tiles = _choose_tiling(B, K, N, HW, x3d.dtype.itemsize)

    b2d = b.reshape(N, 1)

    cost = pl.CostEstimate(
        flops=2 * B * HW * K * N,
        transcendentals=0,
        bytes_accessed=(x3d.dtype.itemsize * B * K * HW     # activations in
                        + 4 * K * N + 4 * N                 # weight + bias
                        + 4 * B * N * HW),                  # activations out (f32)
    )

    return pl.pallas_call(
        _fuse_conv1x1_kernel,
        out_shape=jax.ShapeDtypeStruct((B, N, HW), jnp.float32),
        grid_spec=pltpu.PrefetchScalarGridSpec(
            num_scalar_prefetch=0,
            grid=(B // bb, num_hw_tiles),
            in_specs=[
                pl.BlockSpec((bb, K, tile_hw), lambda bi, j: (bi, 0, j)),  # X
                pl.BlockSpec((N, K), lambda bi, j: (0, 0)),                # weight
                pl.BlockSpec((N, 1), lambda bi, j: (0, 0)),                # bias
            ],
            out_specs=pl.BlockSpec((bb, N, tile_hw), lambda bi, j: (bi, 0, j)),
        ),
        compiler_params=pltpu.CompilerParams(
            dimension_semantics=("parallel", "parallel"),
            vmem_limit_bytes=_VMEM_LIMIT_BYTES,
        ),
        cost_estimate=cost,
    )(x3d, w, b2d)


# ------------------------------ Module port ---------------------------------

class FeatureFusion3dcePallas:
    """JAX/Pallas port of FeatureFusion3dce."""

    def __init__(self, num_image, in_dim, out_dim, key):
        self.num_image = num_image
        self.in_dim = in_dim
        self.out_dim = out_dim
        fan_in = num_image * in_dim  # 1x1 kernel
        # kaiming_uniform_(a=1): bound = sqrt(6 / ((1 + a^2) * fan_in)) = sqrt(3/fan_in)
        bound = (3.0 / fan_in) ** 0.5
        # torch conv weight shape: (out_dim, num_image*in_dim, 1, 1)
        self.weight = jax.random.uniform(
            key, (out_dim, num_image * in_dim, 1, 1),
            minval=-bound, maxval=bound, dtype=jnp.float32)
        self.bias = jnp.zeros((out_dim,), dtype=jnp.float32)  # constant_(0)
        # Matmul form of the 1x1 conv weight, hoisted once: (out_dim, K).
        self.w2d = self.weight[:, :, 0, 0]

    def __call__(self, fs, images=None):
        n = self.num_image
        fused_fs = []
        for x in fs:
            # x: (B*num_image, C, H, W) NCHW
            BN, C, H, W = x.shape
            B = BN // n
            # torch reshape(-1, n*C, H, W) + flattening HxW is a pure metadata
            # reshape in row-major NCHW.  No wrapper-side dtype cast: the kernel
            # reads the native dtype and emits f32 (== x.to(torch.float); conv).
            x3d = jnp.reshape(x, (B, n * C, H * W))
            y3d = _conv1x1_nchw(x3d, self.w2d, self.bias)
            fused_fs.append(jnp.reshape(y3d, (B, self.out_dim, H, W)))

        if images is not None:
            # keep the center image of every group of num_image (plain-JAX glue)
            images.tensors = images.tensors[int(n / 2)::n]
            return (fused_fs, images)
        else:
            # match torch behavior (prints and implicitly returns None)
            print('Error: images is None')


class _ImageList:
    def __init__(self, tensors):
        self.tensors = tensors


# -------------------------------- main --------------------------------------

if __name__ == "__main__":
    key = jax.random.PRNGKey(0)
    k_w, k_x1, k_x2, k_img = jax.random.split(key, 4)

    num_image = 3
    in_dim = 8
    out_dim = 16
    B = 2

    module = FeatureFusion3dcePallas(num_image, in_dim, out_dim, k_w)

    # two FPN-like levels, NCHW, leading dim = B * num_image
    x1 = jax.random.normal(k_x1, (B * num_image, in_dim, 16, 16), dtype=jnp.float32)
    x2 = jax.random.normal(k_x2, (B * num_image, in_dim, 8, 8), dtype=jnp.float32)
    fs = [x1, x2]

    images = _ImageList(
        jax.random.normal(k_img, (B * num_image, 3, 32, 32), dtype=jnp.float32))

    fused_fs, images_out = module(fs, images)
    fused_fs = [jax.block_until_ready(f) for f in fused_fs]

    # reference check in plain JAX (1x1 conv == channel matmul)
    w2d = module.weight[:, :, 0, 0]  # (out_dim, K)
    ok = True
    for x, y in zip(fs, fused_fs):
        BN, C, H, W = x.shape
        xr = jnp.reshape(x, (BN // num_image, num_image * C, H, W)).astype(jnp.float32)
        ref = jnp.einsum('bkhw,ok->bohw', xr, w2d) + module.bias[None, :, None, None]
        ok = ok and bool(jnp.allclose(y, ref, atol=1e-4, rtol=1e-4))
        ok = ok and (y.shape == (BN // num_image, out_dim, H, W))
        ok = ok and (y.dtype == jnp.float32)

    ok = ok and (images_out.tensors.shape[0] == B)

    if ok:
        print("KERNEL_OK")
    else:
        print("KERNEL_MISMATCH")
</pallas_src>

<mosaic_0001>
module attributes {stable_mosaic.version = 11 : i64} {
  func.func @_fuse_conv1x1_kernel(%arg0: i32, %arg1: i32, %arg2: memref<2x24x256xf32, #tpu.memory_space<vmem>>, %arg3: memref<16x24xf32, #tpu.memory_space<vmem>>, %arg4: memref<16x1xf32, #tpu.memory_space<vmem>>, %arg5: memref<2x16x256xf32, #tpu.memory_space<vmem>>) attributes {dimension_semantics = [#tpu.dimension_semantics<parallel>, #tpu.dimension_semantics<parallel>], iteration_bounds = array<i64: 1, 1>, scalar_prefetch = 0 : i64, scratch_operands = 0 : i64, tpu.core_type = #tpu.core_type<tc>, window_params = [{transform_indices = @transform_0, window_bounds = array<i64: 2, 24, 256>}, {pipeline_mode = #tpu.pipeline_mode<synchronous>, transform_indices = @transform_1, window_bounds = array<i64: 16, 24>}, {pipeline_mode = #tpu.pipeline_mode<synchronous>, transform_indices = @transform_2, window_bounds = array<i64: 16, 1>}, {transform_indices = @transform_3, window_bounds = array<i64: 2, 16, 256>}]} {
    %c0 = arith.constant 0 : index
    %c0_0 = arith.constant 0 : index
    %0 = vector.load %arg3[%c0, %c0_0] : memref<16x24xf32, #tpu.memory_space<vmem>>, vector<16x24xf32>
    %c0_1 = arith.constant 0 : index
    %c0_2 = arith.constant 0 : index
    %1 = vector.load %arg4[%c0_1, %c0_2] : memref<16x1xf32, #tpu.memory_space<vmem>>, vector<16x1xf32>
    %c0_3 = arith.constant 0 : index
    %c0_4 = arith.constant 0 : index
    %c0_5 = arith.constant 0 : index
    %2 = vector.load %arg2[%c0_3, %c0_4, %c0_5] : memref<2x24x256xf32, #tpu.memory_space<vmem>>, vector<1x24x256xf32>
    %3 = vector.shape_cast %2 : vector<1x24x256xf32> to vector<24x256xf32>
    %cst = arith.constant dense<0.000000e+00> : vector<16x256xf32>
    %4 = tpu.matmul %0, %3, %cst {dimension_numbers = #tpu.dot_dimension_numbers<[1], [0], [0], [1], [0, 0, 1, 1], [], []>} : vector<16x24xf32>, vector<24x256xf32>, vector<16x256xf32> -> vector<16x256xf32>
    %5 = vector.broadcast %1 : vector<16x1xf32> to vector<16x256xf32>
    %6 = arith.addf %4, %5 : vector<16x256xf32>
    %c0_6 = arith.constant 0 : index
    %c0_7 = arith.constant 0 : index
    %c0_8 = arith.constant 0 : index
    %7 = vector.load %arg5[%c0_6, %c0_7, %c0_8] : memref<2x16x256xf32, #tpu.memory_space<vmem>>, vector<1x16x256xf32>
    %8 = vector.shape_cast %7 : vector<1x16x256xf32> to vector<16x256xf32>
    %9 = vector.shape_cast %6 : vector<16x256xf32> to vector<1x16x256xf32>
    tpu.vector_store %arg5[%c0_6, %c0_7, %c0_8], %9 {strides = array<i32>} : memref<2x16x256xf32, #tpu.memory_space<vmem>>, vector<1x16x256xf32>,
    %c1 = arith.constant 1 : index
    %c0_9 = arith.constant 0 : index
    %c0_10 = arith.constant 0 : index
    %10 = vector.load %arg2[%c1, %c0_9, %c0_10] : memref<2x24x256xf32, #tpu.memory_space<vmem>>, vector<1x24x256xf32>
    %11 = vector.shape_cast %10 : vector<1x24x256xf32> to vector<24x256xf32>
    %cst_11 = arith.constant dense<0.000000e+00> : vector<16x256xf32>
    %12 = tpu.matmul %0, %11, %cst_11 {dimension_numbers = #tpu.dot_dimension_numbers<[1], [0], [0], [1], [0, 0, 1, 1], [], []>} : vector<16x24xf32>, vector<24x256xf32>, vector<16x256xf32> -> vector<16x256xf32>
    %13 = vector.broadcast %1 : vector<16x1xf32> to vector<16x256xf32>
    %14 = arith.addf %12, %13 : vector<16x256xf32>
    %c1_12 = arith.constant 1 : index
    %c0_13 = arith.constant 0 : index
    %c0_14 = arith.constant 0 : index
    %15 = vector.load %arg5[%c1_12, %c0_13, %c0_14] : memref<2x16x256xf32, #tpu.memory_space<vmem>>, vector<1x16x256xf32>
    %16 = vector.shape_cast %15 : vector<1x16x256xf32> to vector<16x256xf32>
    %17 = vector.shape_cast %14 : vector<16x256xf32> to vector<1x16x256xf32>
    tpu.vector_store %arg5[%c1_12, %c0_13, %c0_14], %17 {strides = array<i32>} : memref<2x16x256xf32, #tpu.memory_space<vmem>>, vector<1x16x256xf32>,
    return
  }
  func.func @transform_0(%arg0: i32, %arg1: i32) -> (i32, i32, i32) {
    %c0_i32 = arith.constant 0 : i32
    %c0_i32_0 = arith.constant 0 : i32
    return %arg0, %c0_i32, %arg1 : i32, i32, i32
  }
  func.func @transform_1(%arg0: i32, %arg1: i32) -> (i32, i32) {
    %c0_i32 = arith.constant 0 : i32
    %c0_i32_0 = arith.constant 0 : i32
    %c0_i32_1 = arith.constant 0 : i32
    return %c0_i32, %c0_i32_0 : i32, i32
  }
  func.func @transform_2(%arg0: i32, %arg1: i32) -> (i32, i32) {
    %c0_i32 = arith.constant 0 : i32
    %c0_i32_0 = arith.constant 0 : i32
    %c0_i32_1 = arith.constant 0 : i32
    return %c0_i32, %c0_i32_0 : i32, i32
  }
  func.func @transform_3(%arg0: i32, %arg1: i32) -> (i32, i32, i32) {
    %c0_i32 = arith.constant 0 : i32
    %c0_i32_0 = arith.constant 0 : i32
    return %arg0, %c0_i32, %arg1 : i32, i32, i32
  }
}

</mosaic_0001>

<bundles_post_ra>
// kernel: _conv1x1_nchw.1
= control target key start
LH: loop header
LB: loop body
LE: loop exit
PB: predicated region body
PF: predicated region fallthrough
CT: control target
= control target key end

     0   :  { %8 = vsyncpa [#allocation3], 0  ;;  %s308_s0 = inlined_call_operand.hbm [shape: f32[2,24,256], index: 0, kind: input, shape index: {}]   ;;  %s309_s1 = inlined_call_operand.vmem [shape: f32[16,24], index: 1, kind: input, shape index: {}]   ;;  %s310_s2 = inlined_call_operand.vmem [shape: f32[16,1], index: 2, kind: input, shape index: {}]   ;;  %s311_s3 = inlined_call_operand.hbm [shape: f32[2,16,256], index: 3, kind: output, shape index: {}]  }
   0x1   :  { %9 = vsyncpa [#allocation4], 0  ;;  %s14_s14 = sshll.u32 %s308_s0, 4  ;;  %s251_s15 = smov [#allocation2]   ;;  %s15_s14 = int_to_ptr.hbm [resolvable:$true] %s14_s14 }
   0x2   :  { %s16_s16 = sshll.u32 %s251_s15, 4  ;;  %s252_s17 = smov 256   ;;  %s17_s16 = int_to_ptr.vmem [resolvable:$true] %s16_s16 }
   0x3   :  { %s253_s18 = smov 16  }
   0x4   :  { %22 = dma.hbm_to_vmem [thread:$0]  %s15_s14, 1536, %s17_s16, [#allocation3], %s252_s17, %s252_s17, %s253_s18  }
   0x5   :  { %247 = dma.done.wait [#allocation3], 1536  }
   0x6   :  { %248 = vsyncadd [#allocation3], 4294965760  ;;  %v254_v0 = vmov 0   ;;  %v39_v1 = vld [vmem:[#allocation2 + $0x20] sm:$0xff]  ;;  %v40_v2 = vld [vmem:[#allocation2 + $0x28] sm:$0xff]  ;;  %vm51_vm0 = vcmask 195584  }
   0x7   :  { %198 = vset.pattern.permute.xlu0 %v254_v0  ;;  %v113_v3 = vld [vmem:[#allocation2 + $0x50] sm:$0xff]  ;;  %71 = vmatpush.msra.mxu0 %v39_v1  ;;  %v114_v4 = vld [vmem:[#allocation2 + $0x58] sm:$0xff]  ;;  %v111_v7 = vld [vmem:[#allocation2 + $0x40] sm:$0xff]  ;;  %s172_s28 = sshll.u32 %s311_s3, 4  ;;  %s173_s28 = int_to_ptr.hbm [resolvable:$true] %s172_s28 }
   0x8   :  { %94 = vmatpush.msra.mxu1 %v40_v2  ;;  %v37_v5 = vld [vmem:[#allocation2 + $0x10] sm:$0xff]  ;;  %v38_v6 = vld [vmem:[#allocation2 + $0x18] sm:$0xff]  ;;  %128 = vmatpush.msra.mxu2 %v113_v3  ;;  %v112_v8 = vld [vmem:[#allocation2 + $0x48] sm:$0xff] }
   0x9   :  { %151 = vmatpush.msra.mxu3 %v114_v4  ;;  %v35_v9 = vld [vmem:[#allocation2] sm:$0xff]  ;;  %72 = vmatpush.msra.mxu0 %v37_v5  ;;  %v36_v10 = vld [vmem:[#allocation2 + $0x8] sm:$0xff]  ;;  %v109_v11 = vld [vmem:[#allocation2 + $0x30] sm:$0xff] }
   0xa   :  { %95 = vmatpush.msra.mxu1 %v38_v6  ;;  %v110_v12 = vld [vmem:[#allocation2 + $0x38] sm:$0xff]  ;;  %129 = vmatpush.msra.mxu2 %v111_v7  ;;  %v31_v13 = vld [vmem:[%s309_s1] sm:$0xff]  ;;  %v32_v15 = vld [vmem:[%s309_s1 + $0x8] sm:$0xff]  ;;  %s255_s1 = smov [#allocation5]  }
   0xb   :  { %152 = vmatpush.msra.mxu3 %v112_v8  ;;  %73 = vmatpush.msra.mxu0 %v35_v9  ;;  %v33_v14 = vld [vmem:[%s310_s2] sm:$0xff]  ;;  %v34_v16 = vld [vmem:[%s310_s2 + $0x8] sm:$0xff]  ;;  %s170_s2 = sshll.u32 %s255_s1, 4  ;;  %s171_s2 = int_to_ptr.vmem [resolvable:$true] %s170_s2 }
   0xc   :  { %96 = vmatpush.msra.mxu1 %v36_v10  ;;  %130 = vmatpush.msra.mxu2 %v109_v11 }
   0xd   :  { %153 = vmatpush.msra.mxu3 %v110_v12  ;;  %185 = vmatmul.msk.f32.vlgmr.msra.gmra.mxu0 %vm51_vm0, %v31_v13 }
   0xe   :  { %187 = vmatmul.msk.f32.vlgmr.msra.gmra.mxu1 %vm51_vm0, %v31_v13  ;;  %189 = vmatmul.msk.f32.vlgmr.msra.gmra.mxu2 %vm51_vm0, %v31_v13 }
   0xf   :  { %191 = vmatmul.msk.f32.vlgmr.msra.gmra.mxu3 %vm51_vm0, %v31_v13  ;;  %43 = vperm.xlu0 %198, %v33_v14  }
  0x15   :  { %186 = vmatmul.msk.f32.gmra.mxu0 %vm51_vm0, %v32_v15 }
  0x16   :  { %188 = vmatmul.msk.f32.gmra.mxu1 %vm51_vm0, %v32_v15  ;;  %190 = vmatmul.msk.f32.gmra.mxu2 %vm51_vm0, %v32_v15 }
  0x17   :  { %192 = vmatmul.msk.f32.gmra.mxu3 %vm51_vm0, %v32_v15  ;;  %48 = vperm.xlu0 %198, %v34_v16  }
  0x81   :  { %v44_v17 = vpop.permute.xlu0 %43 }
  0x89   :  { %v49_v22 = vpop.permute.xlu0 %48 }
  0x8a   :  { %v75_v18 = vpop.f32.mrf.mxu0 }
  0x8b   :  { %v98_v19 = vpop.f32.mrf.mxu1  ;;  %v76_v20 = vadd.f32 %v75_v18, %v44_v17 }
  0x8c   :  { %v99_v21 = vadd.f32 %v98_v19, %v44_v17 }
  0x8d   :  { %104 = vst [vmem:[#allocation5] sm:$0xff] %v76_v20 }
  0x8e   :  { %105 = vst [vmem:[#allocation5 + $0x8] sm:$0xff] %v99_v21 }
  0x91   :  { %v132_v23 = vpop.f32.mrf.mxu2 }
  0x92   :  { %v155_v24 = vpop.f32.mrf.mxu3  ;;  %v133_v25 = vadd.f32 %v132_v23, %v44_v17  ;;  %v78_v27 = vpop.f32.mrf.mxu0 }
  0x93   :  { %v156_v26 = vadd.f32 %v155_v24, %v44_v17  ;;  %v101_v28 = vpop.f32.mrf.mxu1  ;;  %v79_v29 = vadd.f32 %v78_v27, %v49_v22 }
  0x94   :  { %v102_v30 = vadd.f32 %v101_v28, %v49_v22  ;;  %162 = vst [vmem:[#allocation5 + $0x20] sm:$0xff] %v133_v25 }
  0x95   :  { %163 = vst [vmem:[#allocation5 + $0x28] sm:$0xff] %v156_v26 }
  0x96   :  { %106 = vst [vmem:[#allocation5 + $0x10] sm:$0xff] %v79_v29 }
  0x97   :  { %107 = vst [vmem:[#allocation5 + $0x18] sm:$0xff] %v102_v30 }
  0x99   :  { %v135_v31 = vpop.f32.mrf.mxu2 }
  0x9a   :  { %v158_v32 = vpop.f32.mrf.mxu3  ;;  %v136_v33 = vadd.f32 %v135_v31, %v49_v22 }
  0x9b   :  { %v159_v34 = vadd.f32 %v158_v32, %v49_v22 }
  0x9c   :  { %164 = vst [vmem:[#allocation5 + $0x30] sm:$0xff] %v136_v33 }
  0x9d   :  { %165 = vst [vmem:[#allocation5 + $0x38] sm:$0xff] %v159_v34 }
  0x9e   :  { %178 = dma.vmem_to_hbm [thread:$0]  %s171_s2, 1024, %s173_s28, [#allocation4], %s252_s17, %s252_s17, %s253_s18  }
  0x9f   :  { %249 = dma.done.wait [#allocation4], 1024  }
  0xa0   :  { %250 = vsyncadd [#allocation4], 4294966272 }
  0xa1   :  { %183 = vsyncpa [#allocation3], 1 }
  0xa2   :  { %184 = vsyncpa [#allocation4], 1 }

</bundles_post_ra>
